<compile_context>
chip_gen: v6e
topology: v6e:2x2x1
jax: 0.10.0
libtpu: 0.0.40
codegen_flags: <defaults>
</compile_context>

<pallas_src>
import functools

import jax
import jax.numpy as jnp
from jax.experimental import pallas as pl
from jax.experimental.pallas import tpu as pltpu


def _stable_sigmoid(x):
    # sigmoid(x) computed with exp of a non-positive argument only:
    #   x >= 0 : 1 / (1 + exp(-x))
    #   x <  0 : exp(x) / (1 + exp(x))
    # No overflow for large |x|, exact reciprocal -> result stays in [0, 1],
    # so the constrained output stays in [min_val, max_val].
    e = jnp.exp(-jnp.abs(x))
    r = 1.0 / (1.0 + e)
    return jnp.where(x >= 0, r, e * r)


# ---------------------------------------------------------------------------
# Single-parameter kernel: exact PyTorch module semantics.
# min_val / scale are compile-time constants; raw param is a (1, 1) f32 block.
# ---------------------------------------------------------------------------
def _single_kernel(raw_ref, out_ref, *, min_val, scale):
    out_ref[...] = min_val + scale * _stable_sigmoid(raw_ref[...])


def range_constrained_parameter(raw_param: jax.Array,
                                min_val: float,
                                max_val: float) -> jax.Array:
    """forward() of RangeConstrainedParameter: (1,) f32 -> (1,) f32."""
    if raw_param.dtype != jnp.float32:
        raw_param = raw_param.astype(jnp.float32)
    raw_2d = raw_param.reshape(1, 1)  # TPU wants >=2D tiles; metadata-only reshape

    kernel = functools.partial(
        _single_kernel,
        min_val=float(min_val),
        scale=float(max_val) - float(min_val))

    out_2d = pl.pallas_call(
        kernel,
        out_shape=jax.ShapeDtypeStruct((1, 1), jnp.float32),
        in_specs=[pl.BlockSpec(memory_space=pltpu.MemorySpace.VMEM)],
        out_specs=pl.BlockSpec(memory_space=pltpu.MemorySpace.VMEM),
        cost_estimate=pl.CostEstimate(
            flops=8, transcendentals=1, bytes_accessed=8),
    )(raw_2d)
    return out_2d.reshape(1)


# ---------------------------------------------------------------------------
# Batched kernel: constrain N parameters in one call.
# Single stacked input (3, N): row 0 = raw, row 1 = min, row 2 = scale.
# Whole-array VMEM blocks -> no padding, one input DMA, one output DMA.
# ---------------------------------------------------------------------------
def _batched_kernel(packed_ref, out_ref):
    p = packed_ref[...]                               # (3, N) f32, one load
    out_ref[...] = p[1:2, :] + p[2:3, :] * _stable_sigmoid(p[0:1, :])


def range_constrained_parameters(raw_params, min_vals, max_vals) -> jax.Array:
    """Constrain N parameters at once: all inputs shape (N,), output (N,) f32."""
    raw = jnp.asarray(raw_params, dtype=jnp.float32).reshape(1, -1)
    mn = jnp.asarray(min_vals, dtype=jnp.float32).reshape(1, -1)
    mx = jnp.asarray(max_vals, dtype=jnp.float32).reshape(1, -1)
    n = raw.shape[1]
    # One stacked input: [raw; min; scale].  When min/max are model constants
    # the bottom two rows constant-fold in the enclosing jit.
    packed = jnp.concatenate([raw, mn, mx - mn], axis=0)  # (3, N)

    out = pl.pallas_call(
        _batched_kernel,
        out_shape=jax.ShapeDtypeStruct((1, n), jnp.float32),
        in_specs=[pl.BlockSpec(memory_space=pltpu.MemorySpace.VMEM)],
        out_specs=pl.BlockSpec(memory_space=pltpu.MemorySpace.VMEM),
        cost_estimate=pl.CostEstimate(
            flops=8 * n, transcendentals=n, bytes_accessed=16 * n),
    )(packed)
    return out.reshape(n)


if __name__ == "__main__":
    key = jax.random.PRNGKey(0)

    # Mirrors torch.randn(1) parameter init.
    raw_param = jax.random.normal(key, (1,), dtype=jnp.float32)
    min_val, max_val = 0.5, 2.5

    # --- single-parameter path (exact module semantics) ---
    out = jax.block_until_ready(
        range_constrained_parameter(raw_param, min_val, max_val))
    ref = min_val + (max_val - min_val) * jax.nn.sigmoid(raw_param)
    assert out.shape == (1,)
    assert jnp.allclose(out, ref, atol=1e-6), (out, ref)
    assert float(out[0]) >= min_val and float(out[0]) <= max_val

    # --- batched path: several RangeConstrainedParameters in one call ---
    key_b, _ = jax.random.split(key)
    raws = jnp.concatenate([
        jax.random.normal(key_b, (3,), dtype=jnp.float32),
        jnp.array([-40.0, 40.0], dtype=jnp.float32),   # extreme values: stability check
    ])
    mins = jnp.array([0.0, 0.5, -1.0, 2.0, 0.1], dtype=jnp.float32)
    maxs = jnp.array([1.0, 2.5, 1.0, 4.0, 0.2], dtype=jnp.float32)
    bout = jax.block_until_ready(range_constrained_parameters(raws, mins, maxs))
    bref = mins + (maxs - mins) * jax.nn.sigmoid(raws)
    assert bout.shape == (5,)
    # Exact sigmoid path -> tight tolerance and hard [min, max] guarantee.
    assert jnp.allclose(bout, bref, atol=1e-6), (bout, bref)
    assert bool(jnp.all(bout >= mins)) and bool(jnp.all(bout <= maxs))
    assert bool(jnp.all(jnp.isfinite(bout)))

    print("KERNEL_OK")
</pallas_src>

<mosaic_0001>
module attributes {stable_mosaic.version = 11 : i64} {
  func.func @_single_kernel(%arg0: memref<1x1xf32, #tpu.memory_space<vmem>>, %arg1: memref<1x1xf32, #tpu.memory_space<vmem>>) attributes {dimension_semantics = [], scalar_prefetch = 0 : i64, scratch_operands = 0 : i64, tpu.core_type = #tpu.core_type<tc>} {
    %c0 = arith.constant 0 : index
    %c0_0 = arith.constant 0 : index
    %0 = vector.load %arg0[%c0, %c0_0] : memref<1x1xf32, #tpu.memory_space<vmem>>, vector<1x1xf32>
    %1 = math.absf %0 : vector<1x1xf32>
    %cst = arith.constant 0.000000e+00 : f32
    %2 = vector.broadcast %cst : f32 to vector<1x1xf32>
    %3 = arith.subf %2, %1 : vector<1x1xf32>
    %4 = math.exp %3 : vector<1x1xf32>
    %cst_1 = arith.constant 1.000000e+00 : f32
    %5 = vector.broadcast %cst_1 : f32 to vector<1x1xf32>
    %6 = arith.addf %5, %4 : vector<1x1xf32>
    %cst_2 = arith.constant 1.000000e+00 : f32
    %7 = vector.broadcast %cst_2 : f32 to vector<1x1xf32>
    %8 = arith.divf %7, %6 : vector<1x1xf32>
    %cst_3 = arith.constant 0.000000e+00 : f32
    %9 = vector.broadcast %cst_3 : f32 to vector<1x1xf32>
    %10 = arith.cmpf oge, %0, %9 : vector<1x1xf32>
    %11 = arith.mulf %4, %8 : vector<1x1xf32>
    %12 = arith.select %10, %8, %11 : vector<1x1xi1>, vector<1x1xf32>
    %cst_4 = arith.constant 2.000000e+00 : f32
    %13 = vector.broadcast %cst_4 : f32 to vector<1x1xf32>
    %14 = arith.mulf %13, %12 : vector<1x1xf32>
    %cst_5 = arith.constant 5.000000e-01 : f32
    %15 = vector.broadcast %cst_5 : f32 to vector<1x1xf32>
    %16 = arith.addf %15, %14 : vector<1x1xf32>
    %c0_6 = arith.constant 0 : index
    %c0_7 = arith.constant 0 : index
    %17 = vector.load %arg1[%c0_6, %c0_7] : memref<1x1xf32, #tpu.memory_space<vmem>>, vector<1x1xf32>
    tpu.vector_store %arg1[%c0_6, %c0_7], %16 {strides = array<i32>} : memref<1x1xf32, #tpu.memory_space<vmem>>, vector<1x1xf32>,
    return
  }
}

</mosaic_0001>

<bundles_post_ra>
// kernel: tpu_custom_call.1
= control target key start
LH: loop header
LB: loop body
LE: loop exit
PB: predicated region body
PF: predicated region fallthrough
CT: control target
= control target key end

     0   :  { %s84_s0 = inlined_call_operand.<no memory space> [shape: f32[1,1], index: 0, kind: input, shape index: {}]   ;;  %s85_s1 = inlined_call_operand.hbm [shape: f32[1,1], index: 1, kind: output, shape index: {}]  }
   0x1   :  { %v6_v0 = vstv %s84_s0 }
   0x2   :  { %7 = vst [vmem:[#allocation2] sm:$0x1] %v6_v0 }
   0x9   :  { %v11_v1 = vld [vmem:[#allocation2] sm:$0x1] }
   0xa   :  { %8 = vsyncpa [#allocation4], 0  ;;  %v12_v2 = vand.u32 2147483647, %v11_v1  ;;  %vm19_vm0 = vcmp.ge.f32.partialorder %v11_v1, 0.0  ;;  %s67_s8 = smov [#allocation3]  }
   0xb   :  { %s32_s9 = sshll.u32 %s67_s8, 4  ;;  %vm24_vm1 = vcmask 0   ;;  %s33_s9 = int_to_ptr.vmem [resolvable:$true] %s32_s9 }
   0xc   :  { %v13_v3 = vsub.f32 0.0, %v12_v2  ;;  %s45_s0 = scalar_lea.vmem %s33_s9, 16  ;;  %s49_s10 = scalar_lea.vmem %s33_s9, 32 }
   0xd   :  { %p46_p0 = scmp.ne.s32.totalorder %s33_s9, %s45_s0  ;;  %p50_p1 = scmp.lt.s32.totalorder %s33_s9, %s33_s9 }
   0xe   :  { %v14_v4 = vmul.f32 1.442695, %v13_v3  ;;  %p51_p2 = scmp.lt.s32.totalorder %s49_s10, %s45_s0 }
  0x10   :  { %41 = vpow2.f32 %v14_v4  ;;  %p52_p3 = por %p51_p2, %p50_p1 }
  0x12   :  { %p53_p4 = pnand %p52_p3, %p46_p0 }
  0x1d   :  { %v42_v5 = vpop.eup %41 }
  0x1e   :  { %v16_v6 = vadd.f32 1.0, %v42_v5 }
  0x20   :  { %43 = vrcp.f32 %v16_v6 }
  0x2d   :  { %v44_v7 = vpop.eup %43 }
  0x2e   :  { %v20_v8 = vmul.f32 %v44_v7, %v42_v5 }
  0x30   :  { %v21_v9 = vsel %vm19_vm0, %v44_v7, %v20_v8 }
  0x31   :  { %v22_v10 = vmul.f32 2.0, %v21_v9 }
  0x33   :  { %v23_v11 = vadd.f32 0.5, %v22_v10 }
  0x35   :  { %25 = vst.msk [vmem:[#allocation3] sm:$0x1] %vm24_vm1, %v23_v11 }
  0x36   :  { %56 = shalt.err (!%p53_p4)
}
  0x37   :  { %35 = dma.vmem_to_hbm [thread:$0]  %s33_s9, 16, %s85_s1, [#allocation4]  }
  0x38   :  { %65 = dma.done.wait [#allocation4], 16  }
  0x39   :  { %66 = vsyncadd [#allocation4], 4294967280 }
  0x3a   :  { %39 = vsyncpa [#allocation4], 1 }

</bundles_post_ra>
